<compile_context>
chip_gen: v7x
topology: tpu7x:2x2x1
jax: 0.10.0
libtpu: 0.0.40
codegen_flags: <defaults>
</compile_context>

<pallas_src>
import jax
import jax.numpy as jnp
from jax.experimental import pallas as pl
from jax.experimental.pallas import tpu as pltpu


def _mlp_kernel(xt_ref, w1_ref, b1_ref, w2_ref, b2_ref, o_ref):
    # xt_ref: [9, TB]   (batch on lanes)
    # w1_ref: [10, 9], b1_ref: [10, 1], w2_ref: [10, 1], b2_ref: [1, 1]
    # o_ref : [1, TB]
    xt = xt_ref[...].astype(jnp.float32)                        # [9, TB]
    # Layer 1: h^T = W1 @ x^T  (MXU; N = TB streams through the array).
    h = jnp.dot(w1_ref[...], xt,
                preferred_element_type=jnp.float32)             # [10, TB]
    h = jnp.maximum(h + b1_ref[...], 0.0)                       # bias + ReLU
    # Layer 2 (10 -> 1): VPU broadcast-multiply + cross-sublane sum; too small
    # to be worth an MXU push/pop.
    o = jnp.sum(h * w2_ref[...], axis=0, keepdims=True)         # [1, TB]
    o_ref[...] = (o + b2_ref[...]).astype(o_ref.dtype)


def _pick_block_batch(batch, block_batch):
    if block_batch is not None:
        assert block_batch % 128 == 0, "block_batch must be a multiple of 128"
        return block_batch
    # Largest lane-aligned tile up to 8192 rows: big enough to amortize the
    # ~0.35 us per-grid-step overhead, small enough that double-buffered
    # (16, TB)-padded f32 input tiles stay far below even v7x's VMEM budget.
    return min(8192, max(128, pl.cdiv(batch, 128) * 128))


def tracknet_v22_classifier(coord_features, w1, b1, w2, b2, *, block_batch=None):
    """coord_features: [B, 9] -> logits [B, 1] (float32).

    Parameters use PyTorch nn.Linear layout: w1 [10, 9], b1 [10],
    w2 [1, 10], b2 [1].
    """
    batch = coord_features.shape[0]
    tb = _pick_block_batch(batch, block_batch)
    grid = (pl.cdiv(batch, tb),)

    # Batch-on-lanes layout for the kernel.
    # TODO(synk): if the producer can emit coord_features already transposed
    # ([9, B]), this wrapper-side XLA transpose (one extra HBM pass) goes away.
    xt = jnp.transpose(coord_features)                          # [9, B]
    w1_f = w1.astype(jnp.float32)                               # [10, 9]
    b1_c = b1.astype(jnp.float32).reshape(10, 1)                # [10, 1]
    w2_c = w2.astype(jnp.float32).reshape(10, 1)                # [10, 1]
    b2_c = b2.astype(jnp.float32).reshape(1, 1)                 # [1, 1]

    const = lambda i: (0, 0)                                    # resident params
    out = pl.pallas_call(
        _mlp_kernel,
        out_shape=jax.ShapeDtypeStruct((1, batch), jnp.float32),
        grid=grid,
        in_specs=[
            pl.BlockSpec((9, tb), lambda i: (0, i)),            # x^T tile (pipelined)
            pl.BlockSpec((10, 9), const),                       # W1   (resident)
            pl.BlockSpec((10, 1), const),                       # b1   (resident)
            pl.BlockSpec((10, 1), const),                       # w2^T (resident)
            pl.BlockSpec((1, 1), const),                        # b2   (resident)
        ],
        out_specs=pl.BlockSpec((1, tb), lambda i: (0, i)),      # lane-dense output
        compiler_params=pltpu.CompilerParams(
            dimension_semantics=("parallel",)),
        cost_estimate=pl.CostEstimate(
            flops=2 * batch * (9 * 10 + 10),
            transcendentals=0,
            bytes_accessed=batch * (9 + 1) * 4 + (90 + 10 + 10 + 1) * 4,
        ),
    )(xt, w1_f, b1_c, w2_c, b2_c)

    return out.reshape(batch, 1)                                # [B, 1] float32


def init_params(key):
    """PyTorch nn.Linear default init (U(-1/sqrt(in), 1/sqrt(in))), torch layout."""
    k1, k2, k3, k4 = jax.random.split(key, 4)
    lim1 = 1.0 / jnp.sqrt(jnp.float32(9))
    lim2 = 1.0 / jnp.sqrt(jnp.float32(10))
    w1 = jax.random.uniform(k1, (10, 9), jnp.float32, -lim1, lim1)
    b1 = jax.random.uniform(k2, (10,), jnp.float32, -lim1, lim1)
    w2 = jax.random.uniform(k3, (1, 10), jnp.float32, -lim2, lim2)
    b2 = jax.random.uniform(k4, (1,), jnp.float32, -lim2, lim2)
    return w1, b1, w2, b2


def reference_forward(x, w1, b1, w2, b2):
    h = jnp.maximum(x @ w1.T + b1, 0.0)
    return (h @ w2.T + b2).astype(jnp.float32)


if __name__ == "__main__":
    key = jax.random.PRNGKey(0)
    kx, ke, kp = jax.random.split(key, 3)
    w1, b1, w2, b2 = init_params(kp)

    # Small smoke test (single grid step; block is lane-padded past the 2 rows).
    batch = 2
    x_small = jax.random.normal(kx, (batch, 9), jnp.float32)
    out = jax.block_until_ready(tracknet_v22_classifier(x_small, w1, b1, w2, b2))
    ref = reference_forward(x_small, w1, b1, w2, b2)
    assert out.shape == (batch, 1) and out.dtype == jnp.float32
    assert jnp.allclose(out, ref, atol=1e-4, rtol=1e-4)

    # Edge-tile test: B not a multiple of the block size -> multi-step grid with
    # a partial final tile (masked writeback) and weights resident across steps.
    batch_e = 300
    x_edge = jax.random.normal(ke, (batch_e, 9), jnp.float32)
    out_e = jax.block_until_ready(
        tracknet_v22_classifier(x_edge, w1, b1, w2, b2, block_batch=128))
    ref_e = reference_forward(x_edge, w1, b1, w2, b2)
    assert out_e.shape == (batch_e, 1) and out_e.dtype == jnp.float32
    assert jnp.allclose(out_e, ref_e, atol=1e-4, rtol=1e-4)

    print("KERNEL_OK")
</pallas_src>

<mosaic_0001>
module attributes {stable_mosaic.version = 11 : i64} {
  func.func @_mlp_kernel(%arg0: i32, %arg1: memref<9x128xf32, #tpu.memory_space<vmem>>, %arg2: memref<10x9xf32, #tpu.memory_space<vmem>>, %arg3: memref<10x1xf32, #tpu.memory_space<vmem>>, %arg4: memref<10x1xf32, #tpu.memory_space<vmem>>, %arg5: memref<1x1xf32, #tpu.memory_space<vmem>>, %arg6: memref<1x128xf32, #tpu.memory_space<vmem>>) attributes {dimension_semantics = [#tpu.dimension_semantics<parallel>], iteration_bounds = array<i64: 1>, scalar_prefetch = 0 : i64, scratch_operands = 0 : i64, tpu.core_type = #tpu.core_type<tc>, window_params = [{transform_indices = @transform_0, window_bounds = array<i64: 9, 128>}, {pipeline_mode = #tpu.pipeline_mode<synchronous>, transform_indices = @transform_1, window_bounds = array<i64: 10, 9>}, {pipeline_mode = #tpu.pipeline_mode<synchronous>, transform_indices = @transform_2, window_bounds = array<i64: 10, 1>}, {pipeline_mode = #tpu.pipeline_mode<synchronous>, transform_indices = @transform_3, window_bounds = array<i64: 10, 1>}, {pipeline_mode = #tpu.pipeline_mode<synchronous>, transform_indices = @transform_4, window_bounds = array<i64: 1, 1>}, {transform_indices = @transform_5, window_bounds = array<i64: 1, 128>}]} {
    %c0 = arith.constant 0 : index
    %c0_0 = arith.constant 0 : index
    %0 = vector.load %arg1[%c0, %c0_0] : memref<9x128xf32, #tpu.memory_space<vmem>>, vector<9x128xf32>
    %c0_1 = arith.constant 0 : index
    %c0_2 = arith.constant 0 : index
    %1 = vector.load %arg2[%c0_1, %c0_2] : memref<10x9xf32, #tpu.memory_space<vmem>>, vector<10x9xf32>
    %cst = arith.constant dense<0.000000e+00> : vector<10x128xf32>
    %2 = tpu.matmul %1, %0, %cst {dimension_numbers = #tpu.dot_dimension_numbers<[1], [0], [0], [1], [0, 0, 1, 1], [], []>} : vector<10x9xf32>, vector<9x128xf32>, vector<10x128xf32> -> vector<10x128xf32>
    %c0_3 = arith.constant 0 : index
    %c0_4 = arith.constant 0 : index
    %3 = vector.load %arg3[%c0_3, %c0_4] : memref<10x1xf32, #tpu.memory_space<vmem>>, vector<10x1xf32>
    %4 = vector.broadcast %3 : vector<10x1xf32> to vector<10x128xf32>
    %5 = arith.addf %2, %4 : vector<10x128xf32>
    %cst_5 = arith.constant 0.000000e+00 : f32
    %6 = vector.broadcast %cst_5 : f32 to vector<10x128xf32>
    %7 = arith.maximumf %5, %6 : vector<10x128xf32>
    %c0_6 = arith.constant 0 : index
    %c0_7 = arith.constant 0 : index
    %8 = vector.load %arg4[%c0_6, %c0_7] : memref<10x1xf32, #tpu.memory_space<vmem>>, vector<10x1xf32>
    %9 = vector.broadcast %8 : vector<10x1xf32> to vector<10x128xf32>
    %10 = arith.mulf %7, %9 : vector<10x128xf32>
    %cst_8 = arith.constant dense<0.000000e+00> : vector<128xf32>
    %11 = vector.multi_reduction <add>, %10, %cst_8 [0] : vector<10x128xf32> to vector<128xf32>
    %12 = vector.shape_cast %11 : vector<128xf32> to vector<1x128xf32>
    %c0_9 = arith.constant 0 : index
    %c0_10 = arith.constant 0 : index
    %13 = vector.load %arg5[%c0_9, %c0_10] : memref<1x1xf32, #tpu.memory_space<vmem>>, vector<1x1xf32>
    %14 = vector.broadcast %13 : vector<1x1xf32> to vector<1x128xf32>
    %15 = arith.addf %12, %14 : vector<1x128xf32>
    %c0_11 = arith.constant 0 : index
    %c0_12 = arith.constant 0 : index
    %16 = vector.load %arg6[%c0_11, %c0_12] : memref<1x128xf32, #tpu.memory_space<vmem>>, vector<1x128xf32>
    tpu.vector_store %arg6[%c0_11, %c0_12], %15 {strides = array<i32>} : memref<1x128xf32, #tpu.memory_space<vmem>>, vector<1x128xf32>,
    return
  }
  func.func @transform_0(%arg0: i32) -> (i32, i32) {
    %c0_i32 = arith.constant 0 : i32
    %c0_i32_0 = arith.constant 0 : i32
    return %c0_i32, %arg0 : i32, i32
  }
  func.func @transform_1(%arg0: i32) -> (i32, i32) {
    %c0_i32 = arith.constant 0 : i32
    %c0_i32_0 = arith.constant 0 : i32
    %c0_i32_1 = arith.constant 0 : i32
    return %c0_i32, %c0_i32_0 : i32, i32
  }
  func.func @transform_2(%arg0: i32) -> (i32, i32) {
    %c0_i32 = arith.constant 0 : i32
    %c0_i32_0 = arith.constant 0 : i32
    %c0_i32_1 = arith.constant 0 : i32
    return %c0_i32, %c0_i32_0 : i32, i32
  }
  func.func @transform_3(%arg0: i32) -> (i32, i32) {
    %c0_i32 = arith.constant 0 : i32
    %c0_i32_0 = arith.constant 0 : i32
    %c0_i32_1 = arith.constant 0 : i32
    return %c0_i32, %c0_i32_0 : i32, i32
  }
  func.func @transform_4(%arg0: i32) -> (i32, i32) {
    %c0_i32 = arith.constant 0 : i32
    %c0_i32_0 = arith.constant 0 : i32
    %c0_i32_1 = arith.constant 0 : i32
    return %c0_i32, %c0_i32_0 : i32, i32
  }
  func.func @transform_5(%arg0: i32) -> (i32, i32) {
    %c0_i32 = arith.constant 0 : i32
    %c0_i32_0 = arith.constant 0 : i32
    return %c0_i32, %arg0 : i32, i32
  }
}

</mosaic_0001>

<bundles_post_ra>
// kernel: tpu_custom_call.1
= control target key start
LH: loop header
LB: loop body
LE: loop exit
PB: predicated region body
PF: predicated region fallthrough
CT: control target
= control target key end

     0   :  { %s297_s0 = inlined_call_operand.vmem [shape: f32[9,2], index: 0, kind: input, shape index: {}]   ;;  %s298_s1 = inlined_call_operand.vmem [shape: f32[10,9], index: 1, kind: input, shape index: {}]   ;;  %s299_s2 = inlined_call_operand.vmem [shape: f32[10,1], index: 2, kind: input, shape index: {}]   ;;  %s300_s3 = inlined_call_operand.vmem [shape: f32[10,1], index: 3, kind: input, shape index: {}]   ;;  %s301_s4 = inlined_call_operand.<no memory space> [shape: f32[1,1], index: 4, kind: input, shape index: {}]   ;;  %s302_s5 = inlined_call_operand.hbm [shape: f32[1,2], index: 5, kind: output, shape index: {}]  }
   0x1   :  { %v10_v0 = vstv %s301_s4 }
   0x2   :  { %11 = vst [vmem:[#allocation2] sm:$0x1] %v10_v0 }
   0x3   :  { %v23_v1 = vld [vmem:[%s297_s0] sm:$0xff]  ;;  %v24_v2 = vld [vmem:[%s297_s0 + $0x8] sm:$0x1]  ;;  %vm46_vm0 = vcmask 1040384   ;;  %vm225_vm1 = vmmov 1   ;;  %vm39_vm3 = vcmask 72704  }
   0x4   :  { %v25_v3 = vld [vmem:[%s298_s1] sm:$0xff]  ;;  %v190_v4 = vpack.c.bf16 %v24_v2, %v23_v1  ;;  %vm191_vm2 = vmpackc.low %vm46_vm0, %vm225_vm1  ;;  %v28_v5 = vld [vmem:[%s299_s2 + $0x8] sm:$0x3]  ;;  %v226_v6 = vmov 0  }
   0x5   :  { %187 = vmatprep.mubr.msk.f32.mxu0 %vm39_vm3, %v25_v3  ;;  %199 = vset.pattern.permute.xlu0 %v226_v6  ;;  %v128_v7 = vld [vmem:[%s300_s3 + $0x8] sm:$0x3] }
   0x6   :  { %192 = vmatprep.subr.msk.bf16.mxu0 %vm191_vm2, %v190_v4  ;;  %36 = vperm.xlu0 %199, %v28_v5  }
   0x7   :  { %12 = vsyncpa [#allocation4], 0  ;;  %195 = vmatpush3.bf16.msk.msra.mxu0 %vm191_vm2, %v190_v4  ;;  %v26_v8 = vld [vmem:[%s298_s1 + $0x8] sm:$0x3]  ;;  %v27_v9 = vld [vmem:[%s299_s2] sm:$0xff]  ;;  %200 = vset.pattern.permute.xlu1 %v226_v6  ;;  %vm141_vm4 = vcmask 1041408   ;;  %v156_v25 = vlaneseq }
   0x8   :  { %136 = vperm.xlu1 %200, %v128_v7   ;;  %v127_v10 = vld [vmem:[%s300_s3] sm:$0xff]  ;;  %s227_s1 = smov [#allocation3]  }
   0x9   :  { %v150_v11 = vld [vmem:[#allocation2] sm:$0x1]  ;;  %v157_v28 = vshrl.u32 %v156_v25, 7  ;;  %s168_s2 = sshll.u32 %s227_s1, 4  ;;  %s169_s2 = int_to_ptr.vmem [resolvable:$true] %s168_s2 }
   0xa   :  { %188 = vmatmul.mubr.msk.f32.vlgmr.msra.gmra.mrb[0].mxu0 %vm39_vm3, %v26_v8  ;;  %31 = vperm.xlu0 %199, %v27_v9   ;;  %s201_s3 = scalar_lea.vmem %s169_s2, 16  ;;  %s205_s9 = scalar_lea.vmem %s169_s2, 32 }
   0xb   :  { %v158_v31 = vsub.s32 0, %v157_v28  ;;  %p202_p0 = scmp.ne.s32.totalorder %s169_s2, %s201_s3  ;;  %p206_p1 = scmp.lt.s32.totalorder %s169_s2, %s169_s2 }
   0xc   :  { %131 = vperm.xlu1 %200, %v127_v10   ;;  %p207_p2 = scmp.lt.s32.totalorder %s205_s9, %s201_s3 }
   0xe   :  { %153 = vperm.xlu0 %199, %v150_v11   ;;  %p208_p3 = por %p207_p2, %p206_p1 }
  0x10   :  { %p209_p4 = pnand %p208_p3, %p202_p0 }
  0x85   :  { %v37_v12 = vpop.permute.xlu0 %36 }
  0x87   :  { %v137_v13 = vpop.permute.xlu1 %136 }
  0x89   :  { %v32_v15 = vpop.permute.xlu0 %31 }
  0x8b   :  { %v132_v22 = vpop.permute.xlu1 %131 }
  0x8d   :  { %v154_v33 = vpop.permute.xlu0 %153 }
  0x8e   :  { %v159_v35 = vrot.slane %v154_v33, %v158_v31 }
  0xdd   :  { %v189_v14 = vpop.f32.mrb[0].mxu0 }
  0xde   :  { %v122_v16 = vadd.f32 %v189_v14, %v37_v12  ;;  %v116_v17 = vpop.f32.mrb[1].mxu0 }
  0xdf   :  { %v117_v18 = vadd.f32 %v116_v17, %v32_v15 }
  0xe0   :  { %v126_v19 = vmax.f32 %v122_v16, 0.0 }
  0xe1   :  { %v125_v20 = vmax.f32 %v117_v18, 0.0 }
  0xe2   :  { %v140_v21 = vmul.f32 %v137_v13, %v126_v19 }
  0xe3   :  { %v139_v23 = vmul.f32 %v132_v22, %v125_v20 }
  0xe4   :  { %v142_v24 = vsel %vm141_vm4, %v140_v21, 0.0 }
  0xe5   :  { %v143_v26 = vadd.f32 %v142_v24, %v139_v23 }
  0xe7   :  { %v144_v27 = vrot.slane %v143_v26, 4 }
  0xe9   :  { %v145_v29 = vadd.f32 %v144_v27, %v143_v26 }
  0xeb   :  { %v146_v30 = vrot.slane %v145_v29, 2 }
  0xed   :  { %v147_v32 = vadd.f32 %v146_v30, %v145_v29 }
  0xef   :  { %v148_v34 = vrot.slane %v147_v32, 1 }
  0xf1   :  { %v149_v36 = vadd.f32 %v148_v34, %v147_v32 }
  0xf3   :  { %v160_v37 = vadd.f32 %v159_v35, %v149_v36 }
  0xf5   :  { %161 = vst [vmem:[#allocation3] sm:$0x1] %v160_v37 }
  0xf6   :  { %212 = shalt.err (!%p209_p4)
}
  0xf7   :  { %s213_s12 = scalar_lea.hbm %s302_s5, 16 }
  0xf8   :  { %p214_p5 = scmp.ne.s32.totalorder %s302_s5, %s213_s12  ;;  %p217_p6 = scmp.lt.u32.totalorder %s213_s12, %s302_s5 }
  0xfa   :  { %p219_p7 = pnand %p217_p6, %p214_p5 }
  0xfc   :  { %222 = shalt.err (!%p219_p7)
}
  0xfd   :  { %171 = dma.vmem_to_hbm [thread:$0]  %s169_s2, 16, %s302_s5, [#allocation4]  }
  0xfe   :  { %223 = dma.done.wait [#allocation4], 16  }
  0xff   :  { %224 = vsyncadd [#allocation4], 4294967280 }
 0x100   :  { %175 = vsyncpa [#allocation4], 1 }

</bundles_post_ra>
